<compile_context>
chip_gen: v6e
topology: v6e:2x2x1
jax: 0.10.0
libtpu: 0.0.40
codegen_flags: <defaults>
</compile_context>

<pallas_src>
import jax
import jax.numpy as jnp
from jax.experimental import pallas as pl
from jax.experimental.pallas import tpu as pltpu

# Module hyper-parameters (defaults of FocalLoss.__init__).
GAMMA = 2.0
ALPHA = 0.5
EPS = 1e-6
MOMENTUM = 0.9
RUNNING_POS_WEIGHT_INIT = 1.0  # register_buffer('running_pos_weight', 1.0)

LANE = 128      # lane width
CHUNK = 8       # rows per in-register chunk -> one (8,128) f32 vreg
MAX_TM = 8192   # rows per grid step (4 MiB f32 logits); sweep 4096-8192


def _round_up(a, b):
    return -(-a // b) * b


def _make_kernel(n, tm, chunks_per_iter):
    """Kernel closure: n (valid elements) and tiling are static constants."""
    n_iters = tm // (CHUNK * chunks_per_iter)

    def kernel(x_ref, y_ref, out_ref):
        # Flat index of each element within an (8,128) chunk (hoisted; JAX
        # does not CSE broadcast_in_dim inside loops).
        idx = (jax.lax.broadcasted_iota(jnp.int32, (CHUNK, LANE), 0) * LANE
               + jax.lax.broadcasted_iota(jnp.int32, (CHUNK, LANE), 1))
        block_base = pl.program_id(0) * (tm * LANE)

        def one_chunk(c, acc_a, acc_b, acc_p):
            r0 = pl.multiple_of(c * CHUNK, CHUNK)
            x = x_ref[pl.ds(r0, CHUNK), :]
            y = y_ref[pl.ds(r0, CHUNK), :].astype(jnp.float32)

            # Mask padded / out-of-bounds (garbage) elements BEFORE any math
            # so NaN/Inf garbage cannot propagate (select, not multiply).
            rem = n - (block_base + c * (CHUNK * LANE))
            valid = idx < rem
            mask = valid.astype(jnp.float32)
            xz = jnp.where(valid, x, 0.0)
            yz = jnp.where(valid, y, 0.0)          # labels are {0,1}; pad -> 0

            is_pos = yz                            # == (labels == 1)
            is_neg = mask - yz                     # == (labels == 0), valid only

            xc = jnp.clip(xz, -10.0, 10.0)         # torch.clamp(logits,-10,10)
            e = jnp.exp(-jnp.abs(xc))              # shared transcendental
            d = 1.0 + e
            t = jnp.log(d)                         # log1p(e)
            sp_pos = jnp.maximum(xc, 0.0) + t      # softplus(x)
            sp_neg = sp_pos - xc                   # softplus(-x)

            r = pl.reciprocal(d, approx=True)      # EUP (free slot)
            r = r * (2.0 - d * r)                  # one Newton step -> ~f32 exact
            p = jnp.where(xc >= 0.0, r, e * r)     # sigmoid(xc); clips are no-ops
            q = 1.0 - p

            acc_a = acc_a + is_neg * (p * p) * sp_pos
            acc_b = acc_b + is_pos * (q * q) * sp_neg
            acc_p = acc_p + is_pos
            return acc_a, acc_b, acc_p

        def body(g, carry):
            acc_a, acc_b, acc_p = carry
            for u in range(chunks_per_iter):       # static unroll for ILP
                acc_a, acc_b, acc_p = one_chunk(
                    g * chunks_per_iter + u, acc_a, acc_b, acc_p)
            return acc_a, acc_b, acc_p

        zero = jnp.zeros((CHUNK, LANE), jnp.float32)
        acc_a, acc_b, acc_p = jax.lax.fori_loop(0, n_iters, body,
                                                (zero, zero, zero))
        out_ref[0, 0] = acc_a
        out_ref[0, 1] = acc_b
        out_ref[0, 2] = acc_p

    return kernel


def focal_loss(logits, labels):
    """Returns (mean focal loss, gamma) — mirrors FocalLoss.forward."""
    x = logits.reshape(-1)
    y = labels.reshape(-1)
    if x.dtype != jnp.float32:
        x = x.astype(jnp.float32)
    if not jnp.issubdtype(y.dtype, jnp.floating):
        y = y.astype(jnp.float32)      # float labels stay in their native dtype
    n = x.shape[0]

    # (m, 128) slab; pad only the ragged tail (values are masked in-kernel).
    m = max(-(-n // LANE), CHUNK)
    n_slab = m * LANE
    if n_slab != n:
        x = jnp.pad(x, (0, n_slab - n))
        y = jnp.pad(y, (0, n_slab - n))
    x2 = x.reshape(m, LANE)            # free when n was already lane-aligned
    y2 = y.reshape(m, LANE)

    # Row tile: as large as possible, but >= 2 grid steps when m > 8 so
    # ("parallel",) can split the grid across both v7x TensorCores.
    if m <= CHUNK:
        tm = m
    else:
        tm = min(MAX_TM, _round_up(-(-m // 2), CHUNK))
    grid_len = -(-m // tm)
    chunks_per_iter = (4 if tm % (4 * CHUNK) == 0
                       else 2 if tm % (2 * CHUNK) == 0 else 1)

    partials = pl.pallas_call(
        _make_kernel(n, tm, chunks_per_iter),
        out_shape=jax.ShapeDtypeStruct((grid_len, 3, CHUNK, LANE), jnp.float32),
        grid=(grid_len,),
        in_specs=[pl.BlockSpec((tm, LANE), lambda i: (i, 0)),   # logits
                  pl.BlockSpec((tm, LANE), lambda i: (i, 0))],  # labels
        out_specs=pl.BlockSpec((1, 3, CHUNK, LANE), lambda i: (i, 0, 0, 0)),
        compiler_params=pltpu.CompilerParams(
            dimension_semantics=("parallel",),
            vmem_limit_bytes=32 * 1024 * 1024),
    )(x2, y2)

    # --- tiny scalar glue: pos_weight selection + running-buffer EMA step ---
    sums = jnp.sum(partials, axis=(0, 2, 3))          # (3,)
    sum_a, sum_b, num_pos = sums[0], sums[1], sums[2]
    num_neg = jnp.float32(n) - num_pos                 # binary labels
    current_pw = jnp.where(num_pos > 0.0,
                           num_neg / jnp.maximum(num_pos, 1.0),
                           jnp.float32(1.0))
    current_pw = jnp.clip(current_pw, 1.0, 2.0)
    # TODO(synk): running_pos_weight is a stateful register_buffer in PyTorch;
    # here we model exactly one EMA step from its initial value of 1.0.
    pw = MOMENTUM * RUNNING_POS_WEIGHT_INIT + (1.0 - MOMENTUM) * current_pw

    mean_loss = ((1.0 - ALPHA) * sum_a + ALPHA * pw * sum_b) / jnp.float32(n)
    return mean_loss, GAMMA


def _reference(logits, labels):
    """Pure-JAX mirror of the PyTorch forward, for correctness checking."""
    x = jnp.clip(logits.astype(jnp.float32), -10.0, 10.0)
    y = labels.astype(jnp.float32)
    num_neg = jnp.sum(y == 0.0).astype(jnp.float32)
    num_pos = jnp.sum(y == 1.0).astype(jnp.float32)
    cur = jnp.where(num_pos > 0.0, num_neg / jnp.maximum(num_pos, 1.0), 1.0)
    cur = jnp.clip(cur, 1.0, 2.0)
    pw = MOMENTUM * RUNNING_POS_WEIGHT_INIT + (1.0 - MOMENTUM) * cur
    p = jnp.clip(jax.nn.sigmoid(x), EPS, 1.0 - EPS)
    ce = pw * y * jax.nn.softplus(-x) + (1.0 - y) * jax.nn.softplus(x)
    pt = jnp.clip(y * p + (1.0 - y) * (1.0 - p), EPS, 1.0)
    fl = jnp.power(1.0 - pt, GAMMA) * ce
    at = ALPHA * y + (1.0 - ALPHA) * (1.0 - y)
    return jnp.mean(at * fl)


if __name__ == "__main__":
    key = jax.random.PRNGKey(0)
    # N=2000: ragged (exercises tail pad + index masking); N=4096: lane-aligned
    # (zero-copy path, non-divisible row blocks masked by index).
    for N in (2000, 4096):
        k1, k2 = jax.random.split(jax.random.fold_in(key, N))
        logits = 3.0 * jax.random.normal(k1, (N,), dtype=jnp.float32)
        labels = jax.random.bernoulli(k2, p=0.35, shape=(N,)).astype(jnp.float32)

        loss, gamma = focal_loss(logits, labels)
        loss = jax.block_until_ready(loss)
        ref = jax.block_until_ready(_reference(logits, labels))
        assert jnp.allclose(loss, ref, rtol=1e-4, atol=1e-6), (N, loss, ref)
        assert gamma == GAMMA

    print("KERNEL_OK")
</pallas_src>

<mosaic_0001>
module attributes {stable_mosaic.version = 11 : i64} {
  func.func @kernel(%arg0: i32, %arg1: memref<8x128xf32, #tpu.memory_space<vmem>>, %arg2: memref<8x128xf32, #tpu.memory_space<vmem>>, %arg3: memref<1x3x8x128xf32, #tpu.memory_space<vmem>>) attributes {dimension_semantics = [#tpu.dimension_semantics<parallel>], iteration_bounds = array<i64: 2>, scalar_prefetch = 0 : i64, scratch_operands = 0 : i64, tpu.core_type = #tpu.core_type<tc>, window_params = [{transform_indices = @transform_0, window_bounds = array<i64: 8, 128>}, {transform_indices = @transform_1, window_bounds = array<i64: 8, 128>}, {transform_indices = @transform_2, window_bounds = array<i64: 1, 3, 8, 128>}]} {
    %0 = tpu.iota {dimensions = array<i32: 0>} : vector<8x128xi32>
    %c128_i32 = arith.constant 128 : i32
    %1 = vector.broadcast %c128_i32 : i32 to vector<8x128xi32>
    %2 = arith.muli %0, %1 : vector<8x128xi32>
    %3 = tpu.iota {dimensions = array<i32: 1>} : vector<8x128xi32>
    %4 = arith.addi %2, %3 : vector<8x128xi32>
    %c1024_i32 = arith.constant 1024 : i32
    %5 = arith.muli %arg0, %c1024_i32 : i32
    %cst = arith.constant 0.000000e+00 : f32
    %6 = vector.broadcast %cst : f32 to vector<8x128xf32>
    %c0_i32 = arith.constant 0 : i32
    %c1_i32 = arith.constant 1 : i32
    %7 = arith.muli %c0_i32, %c1_i32 : i32
    %c0_i32_0 = arith.constant 0 : i32
    %8 = arith.addi %7, %c0_i32_0 : i32
    %c8_i32 = arith.constant 8 : i32
    %9 = arith.muli %8, %c8_i32 : i32
    %10 = tpu.assume_multiple %9, 8 : i32
    %11 = arith.index_cast %10 : i32 to index
    %c0 = arith.constant 0 : index
    %12 = vector.load %arg1[%11, %c0] : memref<8x128xf32, #tpu.memory_space<vmem>>, vector<8x128xf32>
    %13 = arith.index_cast %10 : i32 to index
    %c0_1 = arith.constant 0 : index
    %14 = vector.load %arg2[%13, %c0_1] : memref<8x128xf32, #tpu.memory_space<vmem>>, vector<8x128xf32>
    %c1024_i32_2 = arith.constant 1024 : i32
    %15 = arith.muli %8, %c1024_i32_2 : i32
    %16 = arith.addi %5, %15 : i32
    %c2000_i32 = arith.constant 2000 : i32
    %17 = arith.subi %c2000_i32, %16 : i32
    %18 = vector.broadcast %17 : i32 to vector<8x128xi32>
    %19 = arith.cmpi slt, %4, %18 : vector<8x128xi32>
    %20 = arith.extui %19 : vector<8x128xi1> to vector<8x128xi32>
    %21 = arith.sitofp %20 : vector<8x128xi32> to vector<8x128xf32>
    %cst_3 = arith.constant 0.000000e+00 : f32
    %22 = vector.broadcast %cst_3 : f32 to vector<8x128xf32>
    %23 = arith.select %19, %12, %22 : vector<8x128xi1>, vector<8x128xf32>
    %cst_4 = arith.constant 0.000000e+00 : f32
    %24 = vector.broadcast %cst_4 : f32 to vector<8x128xf32>
    %25 = arith.select %19, %14, %24 : vector<8x128xi1>, vector<8x128xf32>
    %26 = arith.subf %21, %25 : vector<8x128xf32>
    %cst_5 = arith.constant -1.000000e+01 : f32
    %cst_6 = arith.constant 1.000000e+01 : f32
    %27 = vector.broadcast %cst_5 : f32 to vector<8x128xf32>
    %28 = arith.maximumf %27, %23 : vector<8x128xf32>
    %29 = vector.broadcast %cst_6 : f32 to vector<8x128xf32>
    %30 = arith.minimumf %29, %28 : vector<8x128xf32>
    %31 = math.absf %30 : vector<8x128xf32>
    %cst_7 = arith.constant 0.000000e+00 : f32
    %32 = vector.broadcast %cst_7 : f32 to vector<8x128xf32>
    %33 = arith.subf %32, %31 : vector<8x128xf32>
    %34 = math.exp %33 : vector<8x128xf32>
    %cst_8 = arith.constant 1.000000e+00 : f32
    %35 = vector.broadcast %cst_8 : f32 to vector<8x128xf32>
    %36 = arith.addf %35, %34 : vector<8x128xf32>
    %37 = math.log %36 : vector<8x128xf32>
    %cst_9 = arith.constant 0.000000e+00 : f32
    %38 = vector.broadcast %cst_9 : f32 to vector<8x128xf32>
    %39 = arith.maximumf %30, %38 : vector<8x128xf32>
    %40 = arith.addf %39, %37 : vector<8x128xf32>
    %41 = arith.subf %40, %30 : vector<8x128xf32>
    %42 = tpu.reciprocal %36 {approx = true} : vector<8x128xf32> -> vector<8x128xf32>
    %43 = arith.mulf %36, %42 : vector<8x128xf32>
    %cst_10 = arith.constant 2.000000e+00 : f32
    %44 = vector.broadcast %cst_10 : f32 to vector<8x128xf32>
    %45 = arith.subf %44, %43 : vector<8x128xf32>
    %46 = arith.mulf %42, %45 : vector<8x128xf32>
    %cst_11 = arith.constant 0.000000e+00 : f32
    %47 = vector.broadcast %cst_11 : f32 to vector<8x128xf32>
    %48 = arith.cmpf oge, %30, %47 : vector<8x128xf32>
    %49 = arith.mulf %34, %46 : vector<8x128xf32>
    %50 = arith.select %48, %46, %49 : vector<8x128xi1>, vector<8x128xf32>
    %cst_12 = arith.constant 1.000000e+00 : f32
    %51 = vector.broadcast %cst_12 : f32 to vector<8x128xf32>
    %52 = arith.subf %51, %50 : vector<8x128xf32>
    %53 = arith.mulf %50, %50 : vector<8x128xf32>
    %54 = arith.mulf %26, %53 : vector<8x128xf32>
    %55 = arith.mulf %54, %40 : vector<8x128xf32>
    %56 = arith.addf %6, %55 : vector<8x128xf32>
    %57 = arith.mulf %52, %52 : vector<8x128xf32>
    %58 = arith.mulf %25, %57 : vector<8x128xf32>
    %59 = arith.mulf %58, %41 : vector<8x128xf32>
    %60 = arith.addf %6, %59 : vector<8x128xf32>
    %61 = arith.addf %6, %25 : vector<8x128xf32>
    %c1_i32_13 = arith.constant 1 : i32
    %c0_14 = arith.constant 0 : index
    %c0_15 = arith.constant 0 : index
    %c0_16 = arith.constant 0 : index
    %c0_17 = arith.constant 0 : index
    %62 = vector.load %arg3[%c0_14, %c0_15, %c0_16, %c0_17] : memref<1x3x8x128xf32, #tpu.memory_space<vmem>>, vector<1x1x8x128xf32>
    %63 = vector.shape_cast %62 : vector<1x1x8x128xf32> to vector<8x128xf32>
    %64 = vector.shape_cast %56 : vector<8x128xf32> to vector<1x1x8x128xf32>
    tpu.vector_store %arg3[%c0_14, %c0_15, %c0_16, %c0_17], %64 {strides = array<i32>} : memref<1x3x8x128xf32, #tpu.memory_space<vmem>>, vector<1x1x8x128xf32>,
    %c0_18 = arith.constant 0 : index
    %c1 = arith.constant 1 : index
    %c0_19 = arith.constant 0 : index
    %c0_20 = arith.constant 0 : index
    %65 = vector.load %arg3[%c0_18, %c1, %c0_19, %c0_20] : memref<1x3x8x128xf32, #tpu.memory_space<vmem>>, vector<1x1x8x128xf32>
    %66 = vector.shape_cast %65 : vector<1x1x8x128xf32> to vector<8x128xf32>
    %67 = vector.shape_cast %60 : vector<8x128xf32> to vector<1x1x8x128xf32>
    tpu.vector_store %arg3[%c0_18, %c1, %c0_19, %c0_20], %67 {strides = array<i32>} : memref<1x3x8x128xf32, #tpu.memory_space<vmem>>, vector<1x1x8x128xf32>,
    %c0_21 = arith.constant 0 : index
    %c2 = arith.constant 2 : index
    %c0_22 = arith.constant 0 : index
    %c0_23 = arith.constant 0 : index
    %68 = vector.load %arg3[%c0_21, %c2, %c0_22, %c0_23] : memref<1x3x8x128xf32, #tpu.memory_space<vmem>>, vector<1x1x8x128xf32>
    %69 = vector.shape_cast %68 : vector<1x1x8x128xf32> to vector<8x128xf32>
    %70 = vector.shape_cast %61 : vector<8x128xf32> to vector<1x1x8x128xf32>
    tpu.vector_store %arg3[%c0_21, %c2, %c0_22, %c0_23], %70 {strides = array<i32>} : memref<1x3x8x128xf32, #tpu.memory_space<vmem>>, vector<1x1x8x128xf32>,
    return
  }
  func.func @transform_0(%arg0: i32) -> (i32, i32) {
    %c0_i32 = arith.constant 0 : i32
    %c0_i32_0 = arith.constant 0 : i32
    return %arg0, %c0_i32 : i32, i32
  }
  func.func @transform_1(%arg0: i32) -> (i32, i32) {
    %c0_i32 = arith.constant 0 : i32
    %c0_i32_0 = arith.constant 0 : i32
    return %arg0, %c0_i32 : i32, i32
  }
  func.func @transform_2(%arg0: i32) -> (i32, i32, i32, i32) {
    %c0_i32 = arith.constant 0 : i32
    %c0_i32_0 = arith.constant 0 : i32
    %c0_i32_1 = arith.constant 0 : i32
    %c0_i32_2 = arith.constant 0 : i32
    return %arg0, %c0_i32, %c0_i32_0, %c0_i32_1 : i32, i32, i32, i32
  }
}

</mosaic_0001>

<bundles_post_ra>
// kernel: tpu_custom_call.1
= control target key start
LH: loop header
LB: loop body
LE: loop exit
PB: predicated region body
PF: predicated region fallthrough
CT: control target
= control target key end

     0   :  { %7 = vsyncpa [#allocation3], 0  ;;  %s810_s0 = inlined_call_operand.hbm [shape: f32[16,128], index: 0, kind: input, shape index: {}]   ;;  %s811_s1 = inlined_call_operand.hbm [shape: f32[16,128], index: 1, kind: input, shape index: {}]   ;;  %s812_s2 = inlined_call_operand.hbm [shape: f32[2,3,8,128], index: 2, kind: output, shape index: {}]  }
   0x1   :  { %9 = vsyncpa [#allocation3 + $0x1], 0 }
   0x2   :  { %10 = vsyncpa [#allocation6], 0 }
   0x3   :  { %12 = vsyncpa [#allocation6 + $0x1], 0 }
   0x4   :  { %13 = vsyncpa [#allocation4], 0 }
   0x5   :  { %15 = vsyncpa [#allocation4 + $0x1], 0  ;;  %s584_s9 = smov 0   ;;  %s586_s10 = smov 0  }
   0x6   :  { %s588_s11 = smov 0   ;;  %s590_s12 = smov 0  }
   0x7 LB: > { %s605_s13 = sadd.s32 4294967295, %s561_s12   ;;  %s357_s14 = sadd.s32 4294967294, %s561_s12   ;;  %s561_s12 = sphi %s590_s12, %s833_s12   ;;  %s557_s11 = sphi %s588_s11, %s832_s11   ;;  %s553_s10 = sphi %s586_s10, %s831_s10   ;;  %s549_s9 = sphi %s584_s9, %s830_s9  }
   0x8   : > { %s609_s15 = sadd.s32 1, %s561_s12   ;;  %s28_s16 = sadd.s32 1, %s557_s11 }
   0x9   : > { %s25_s17 = ssub.s32 %s561_s12, %s609_s15  ;;  %p35_p0 = scmp.ne.s32.totalorder %s557_s11, %s553_s10 }
   0xa   : > { %p26_p1 = scmp.eq.s32.totalorder %s25_s17, 0  ;;  %p36_p2 = scmp.eq.s32.totalorder %s561_s12, 0 }
   0xb   : > { %p41_p3 = scmp.ne.s32.totalorder %s553_s10, %s549_s9  ;;  %p42_p4 = scmp.eq.s32.totalorder %s605_s13, 0 }
   0xc   : > { %s621_s18 = scalar_select %p26_p1, %s557_s11, %s28_s16  }
   0xd   : > { %p623_p5 = por %p36_p2, %p35_p0  ;;  %p627_p6 = por %p42_p4, %p41_p3 }
   0xe   : > { %p91_p7 = scmp.eq.s32.totalorder %s605_s13, 1  ;;  %p97_p8 = scmp.eq.s32.totalorder %s357_s14, 1 }
   0xf   : > { %s816_s20 = scalar_select %p627_p6, 1, 0 }
  0x10   : > { %p394_p10 = scmp.lt.s32.totalorder %s561_s12, 2  ;;  %p634_p11 = por %p91_p7, %p35_p0 }
  0x11   : > { %p638_p12 = por %p97_p8, %p41_p3  ;;  %s643_s23 = sand.u32 1, %s557_s11  }
  0x12   : > { %s817_s21 = scalar_select %p634_p11, 1, 0 }
  0x13   : > { %s818_s22 = scalar_select %p638_p12, 1, 0 }
  0x14   : > { %s361_s24 = sshll.u32 %s561_s12, 7  ;;  %s360_s25 = sshll.u32 %s643_s23, 3 }
  0x15   : > { %s652_s28 = scalar_lea.hbm %s810_s0, %s361_s24  ;;  %s121_s29 = scalar_lea.vmem [#allocation2], %s360_s25 }
  0x16   : > { %s128_s30 = sshll.u32 %s121_s29, 4  ;;  %p658_p13 = pnand %p394_p10, %p623_p5  ;;  %s662_s30 = int_to_ptr.vmem [resolvable:$true] %s128_s30 }
  0x17   : > { %s118_s4 = scalar_lea.sflag [#allocation3], %s643_s23  ;;  %s437_s5 = scalar_lea.hbm %s652_s28, 128 }
  0x18   : > { %p438_p2 = scmp.ne.s32.totalorder %s652_s28, %s437_s5  ;;  %p439_p3 = pneg %p658_p13 }
  0x19   : > { %s442_s8 = scalar_lea.hbm %s810_s0, 256  ;;  %p443_p5 = scmp.lt.s32.totalorder %s652_s28, %s810_s0 }
  0x1a   : > { %p440_p4 = pnand %p439_p3, %p438_p2  ;;  %p444_p8 = scmp.lt.s32.totalorder %s442_s8, %s437_s5 }
  0x1c   : > { %p441_p7 = pneg %p440_p4  ;;  %p445_p10 = por %p444_p8, %p443_p5 }
  0x1e   : > { %p446_p9 = pnand %p445_p10, %p441_p7 }
  0x20   : > { %449 = shalt.err (!%p446_p9)
}
  0x21   : > { %s450_s17 = scalar_lea.vmem %s662_s30, 128  ;;  %s563_s19 = smov [#allocation2]  }
  0x22   : > { %p451_p0 = scmp.ne.s32.totalorder %s662_s30, %s450_s17  ;;  %s455_s26 = sshll.u32 %s563_s19, 4  ;;  %s456_s26 = int_to_ptr.vmem [resolvable:$false] %s455_s26 }
  0x23   : > { %s457_s27 = scalar_lea.vmem %s456_s26, 256  ;;  %p458_p1 = scmp.lt.s32.totalorder %s662_s30, %s456_s26 }
  0x24   : > { %p453_p2 = pnand %p451_p0, %p439_p3  ;;  %p459_p12 = scmp.lt.s32.totalorder %s457_s27, %s450_s17 }
  0x26   : > { %p454_p4 = pneg %p453_p2  ;;  %p460_p11 = por %p459_p12, %p458_p1 }
  0x28   : > { %p461_p5 = pnand %p460_p11, %p454_p4 }
  0x2a   : > { %464 = shalt.err (!%p461_p5)
}
  0x2b   : > { %386 = dma.hbm_to_vmem [thread:$0]  (!%p658_p13), %s652_s28, 128, %s662_s30, %s118_s4  }
  0x2c   : > { %p820_p9 = scmp.lt.s32.totalorder %s561_s12, 3  ;;  %p821_p0 = scmp.ge.s32.totalorder %s561_s12, 1 }
  0x2d   : > { %s704_s7 = scalar_lea.hbm %s811_s1, %s361_s24  ;;  %s139_s8 = scalar_lea.vmem [#allocation5], %s360_s25 }
  0x2e   : > { %p695_p7 = pnand %p821_p0, %p820_p9  ;;  %s146_s14 = sshll.u32 %s139_s8, 4  ;;  %s147_s14 = int_to_ptr.vmem [resolvable:$true] %s146_s14 }
  0x2f   : > { %s136_s28 = scalar_lea.sflag [#allocation6], %s643_s23  ;;  %s465_s30 = scalar_lea.hbm %s704_s7, 128 }
  0x30   : > { %s822_s29 = scalar_select %p695_p7, 1, 0 }
  0x31   : > { %p466_p11 = scmp.ne.s32.totalorder %s704_s7, %s465_s30  ;;  %s470_s17 = scalar_lea.hbm %s811_s1, 256 }
  0x32   : > { %p471_p8 = scmp.lt.s32.totalorder %s704_s7, %s811_s1  ;;  %p472_p10 = scmp.lt.s32.totalorder %s470_s17, %s465_s30 }
  0x33   : > { %p468_p12 = pnand %p466_p11, %p439_p3 }
  0x34   : > { %p473_p2 = por %p472_p10, %p471_p8 }
  0x35   : > { %p469_p1 = pneg %p468_p12 }
  0x37   : > { %p474_p4 = pnand %p473_p2, %p469_p1 }
  0x39   : > { %477 = shalt.err (!%p474_p4)
}
  0x3a   : > { %s478_s25 = scalar_lea.vmem %s147_s14, 128  ;;  %s564_s23 = smov [#allocation5]  }
  0x3b   : > { %p479_p5 = scmp.ne.s32.totalorder %s147_s14, %s478_s25  ;;  %s483_s26 = sshll.u32 %s564_s23, 4  ;;  %s484_s26 = int_to_ptr.vmem [resolvable:$false] %s483_s26 }
  0x3c   : > { %s485_s27 = scalar_lea.vmem %s484_s26, 256  ;;  %p486_p11 = scmp.lt.s32.totalorder %s147_s14, %s484_s26 }
  0x3d   : > { %p481_p9 = pnand %p479_p5, %p439_p3  ;;  %p487_p12 = scmp.lt.s32.totalorder %s485_s27, %s478_s25 }
  0x3f   : > { %p482_p0 = pneg %p481_p9  ;;  %p488_p6 = por %p487_p12, %p486_p11 }
  0x41   : > { %p489_p7 = pnand %p488_p6, %p482_p0 }
  0x43   : > { %492 = shalt.err (!%p489_p7)
}
  0x44   : > { %389 = dma.hbm_to_vmem [thread:$0]  (!%p658_p13), %s704_s7, 128, %s147_s14, %s136_s28  }
  0x45   : > { %p823_p1 = scmp.ne.s32.totalorder %s822_s29, 0 }
  0x46   : > { %s730_s5 = sand.u32 (!%p823_p1), 1, %s553_s10   ;;  %p824_p3 = scmp.ne.s32.totalorder (!%p823_p1), %s816_s20, 0 }
  0x47   : > { %155 = sbr.rel (%p823_p1) target bundleno = 158 (0x9e), region = 28  ;;  %s365_s6 = sshll.u32 (!%p823_p1), %s730_s5, 3 }
  0x48   : > { %s158_s8 = scalar_lea.sflag (!%p823_p1), [#allocation3], %s730_s5  ;;  %s161_s30 = scalar_lea.vmem (!%p823_p1), [#allocation2], %s365_s6 }
  0x4c   : > { %536 = dma.done.wait (%p824_p3), %s158_s8, 128  }
  0x4d   : > { %538 = vsyncadd (%p824_p3), %s158_s8, 4294967168  ;;  %s167_s3 = scalar_lea.sflag [#allocation6], %s730_s5  ;;  %s170_s7 = scalar_lea.vmem [#allocation5], %s365_s6 }
  0x4e   : > { %540 = dma.done.wait (%p824_p3), %s167_s3, 128  }
  0x4f   : > { %542 = vsyncadd (%p824_p3), %s167_s3, 4294967168  ;;  %v196_v0 = vlaneseq  ;;  %s367_s29 = sshll.u32 %s605_s13, 10  ;;  %s375_s28 = smul.u32 24, %s730_s5  ;;  %v203_v6 = vld [vmem:[%s161_s30] sm:$0xff]  ;;  %v204_v7 = vld [vmem:[%s170_s7] sm:$0xff]  ;;  %v565_v23 = vmov 0.0  }
  0x50   : > { %s205_s14 = ssub.s32 2000, %s367_s29  ;;  %s376_s16 = smul.u32 384, %s605_s13 }
  0x51   : > { %v197_v1 = vshrl.u32 %v196_v0, 7  ;;  %v200_v2 = vand.u32 127, %v196_v0  ;;  %v206_v4 = vstv %s205_s14  ;;  %s753_s20 = scalar_lea.vmem [#allocation7], %s375_s28  ;;  %s248_s25 = scalar_lea.sflag [#allocation4], %s730_s5 }
  0x52   : > { %s261_s4 = sshll.u32 %s753_s20, 4  ;;  %s766_s19 = scalar_lea.hbm %s812_s2, %s376_s16  ;;  %s760_s4 = int_to_ptr.vmem [resolvable:$true] %s261_s4 }
  0x53   : > { %v198_v3 = vmul.u32 128, %v197_v1  ;;  %s493_s23 = scalar_lea.vmem %s760_s4, 384  ;;  %p827_p13 = scmp.ne.s32.totalorder %s817_s21, 0 }
  0x54   : > { %p494_p6 = scmp.ne.s32.totalorder %s760_s4, %s493_s23  ;;  %s566_s13 = smov [#allocation7]  }
  0x55   : > { %v201_v5 = vadd.s32 %v200_v2, %v198_v3  ;;  %s497_s26 = sshll.u32 %s566_s13, 4  ;;  %s498_s26 = int_to_ptr.vmem [resolvable:$false] %s497_s26 }
  0x56   : > { %p495_p7 = pnand %p494_p6, %p827_p13  ;;  %s499_s27 = scalar_lea.vmem %s498_s26, 768 }
  0x57   : > { %vm745_vm0 = vcmp.lt.s32.totalorder %v201_v5, %v206_v4  ;;  %p500_p10 = scmp.lt.s32.totalorder %s760_s4, %s498_s26  ;;  %p501_p2 = scmp.lt.s32.totalorder %s499_s27, %s493_s23 }
  0x58   : > { %v210_v9 = vsel %vm745_vm0, %v203_v6, 0.0  ;;  %v211_v10 = vsel %vm745_vm0, %v204_v7, 0.0  ;;  %v368_v24 = vsel %vm745_vm0, 1.0, %v565_v23  ;;  %p496_p8 = pneg %p495_p7 }
  0x59   : > { %v369_v11 = vclamps-f32 %v210_v9, 10.0  ;;  %371 = vst [vmem:[%s753_s20 + $0x10] sm:$0xff] %v211_v10  ;;  %v212_v27 = vsub.f32 %v368_v24, %v211_v10  ;;  %p502_p4 = por %p501_p2, %p500_p10 }
  0x5b   : > { %v215_v12 = vand.u32 2147483647, %v369_v11  ;;  %v222_v22 = vmax.f32 %v369_v11, 0.0  ;;  %vm229_vm1 = vcmp.ge.f32.partialorder %v369_v11, 0.0  ;;  %p503_p5 = pnand %p502_p4, %p496_p8 }
  0x5d   : > { %v216_v13 = vsub.f32 0.0, %v215_v12 }
  0x5f   : > { %v217_v14 = vmul.f32 1.442695, %v216_v13 }
  0x61   : > { %431 = vpow2.f32 %v217_v14 }
  0x6e   : > { %v432_v15 = vpop.eup %431 }
  0x6f   : > { %v219_v16 = vadd.f32 1.0, %v432_v15 }
  0x71   : > { %433 = vrcp.f32 %v219_v16 }
  0x72   : > { %435 = vlog2.f32 %v219_v16 }
  0x7e   : > { %v434_v17 = vpop.eup %433 }
  0x7f   : > { %v436_v18 = vpop.eup %435  ;;  %v226_v19 = vmul.f32 %v434_v17, %v219_v16 }
  0x80   : > { %v221_v21 = vmul.f32 0.6931472, %v436_v18 }
  0x81   : > { %v227_v20 = vsub.f32 2.0, %v226_v19 }
  0x82   : > { %v223_v28 = vadd.f32 %v222_v22, %v221_v21 }
  0x83   : > { %v228_v25 = vmul.f32 %v434_v17, %v227_v20 }
  0x84   : > { %v224_v33 = vsub.f32 %v223_v28, %v369_v11 }
  0x85   : > { %v230_v26 = vmul.f32 %v432_v15, %v228_v25 }
  0x87   : > { %v231_v29 = vsel %vm229_vm1, %v228_v25, %v230_v26 }
  0x88   : > { %v233_v30 = vmul.f32 %v231_v29, %v231_v29  ;;  %v232_v31 = vsub.f32 1.0, %v231_v29 }
  0x8a   : > { %v234_v32 = vmul.f32 %v233_v30, %v212_v27  ;;  %v237_v34 = vmul.f32 %v232_v31, %v232_v31 }
  0x8c   : > { %v235_v35 = vmul.f32 %v234_v32, %v223_v28  ;;  %v238_v36 = vmul.f32 %v237_v34, %v211_v10 }
  0x8e   : > { %242 = vst [vmem:[%s753_s20] sm:$0xff] %v235_v35  ;;  %v239_v37 = vmul.f32 %v238_v36, %v224_v33 }
  0x90   : > { %370 = vst [vmem:[%s753_s20 + $0x8] sm:$0xff] %v239_v37 }
  0x91   : > { %506 = shalt.err (!%p503_p5)
}
  0x92   : > { %s507_s6 = scalar_lea.hbm %s766_s19, 384  ;;  %s511_s3 = scalar_lea.hbm %s812_s2, 768 }
  0x93   : > { %p508_p9 = scmp.ne.s32.totalorder %s766_s19, %s507_s6  ;;  %p512_p12 = scmp.lt.s32.totalorder %s766_s19, %s812_s2 }
  0x94   : > { %p513_p1 = scmp.lt.s32.totalorder %s511_s3, %s507_s6 }
  0x95   : > { %p509_p0 = pnand %p508_p9, %p827_p13 }
  0x96   : > { %p514_p3 = por %p513_p1, %p512_p12 }
  0x97   : > { %p510_p11 = pneg %p509_p0 }
  0x99   : > { %p515_p6 = pnand %p514_p3, %p510_p11 }
  0x9b   : > { %518 = shalt.err (!%p515_p6)
}
  0x9c   : > { %s567_s14 = smov 128   ;;  %s568_s28 = smov 8  }
  0x9d   : > { %381 = dma.vmem_to_hbm [thread:$0]  (%p827_p13), %s760_s4, 384, %s766_s19, %s248_s25, %s567_s14, %s567_s14, %s568_s28  }
  0x9e PF: > { %s276_s20 = sand.u32 1, %s549_s9   ;;  %p828_p7 = scmp.ne.s32.totalorder %s818_s22, 0 }
  0x9f   : > { %p829_p8 = scmp.ge.s32.totalorder %s561_s12, 2  ;;  %s277_s16 = scalar_lea.sflag [#allocation4], %s276_s20 }
  0xa1   : > { %p391_p10 = pnand %p829_p8, %p828_p7 }
  0xa3   : > { %p392_p2 = pneg %p391_p10 }
  0xa5   : > { %544 = dma.done.wait (%p392_p2), %s277_s16, 384  }
  0xa6   : > { %546 = vsyncadd (%p392_p2), %s277_s16, 4294966912  ;;  %p18_p4 = scmp.ge.s32.totalorder %s609_s15, 4   ;;  %s830_s9 = smov %s553_s10 }
  0xa7   : > { %s831_s10 = smov %s557_s11  ;;  %s832_s11 = smov %s621_s18 }
  0xa8   : > { %s833_s12 = smov %s609_s15  ;;  %20 = sbr.rel (!%p18_p4) target bundleno = 7 (0x7), region = 88 }
  0xad   :  { %282 = vsyncpa [#allocation3], 1 }
  0xae   :  { %284 = vsyncpa [#allocation3 + $0x1], 1 }
  0xaf   :  { %285 = vsyncpa [#allocation6], 1 }
  0xb0   :  { %287 = vsyncpa [#allocation6 + $0x1], 1 }
  0xb1   :  { %288 = vsyncpa [#allocation4], 1 }
  0xb2   :  { %290 = vsyncpa [#allocation4 + $0x1], 1 }

</bundles_post_ra>
